<compile_context>
chip_gen: v7x
topology: tpu7x:2x2x1
jax: 0.10.0
libtpu: 0.0.40
codegen_flags: <defaults>
</compile_context>

<pallas_src>
import functools
from typing import List, Optional, Sequence, Tuple

import jax
import jax.numpy as jnp
from jax.experimental import pallas as pl
from jax.experimental.pallas import tpu as pltpu


# ---------------------------------------------------------------------------
# Kernel
# ---------------------------------------------------------------------------
def _mlp_fused_kernel(*refs, n_layers: int):
    """refs = (x_ref, w0, b0, w1, b1, ..., out_ref).

    x_ref : (tm, K0)           activation tile for this grid step
    wi    : (Ki, Ni)           weight, already stored as (in, out)
    bi    : (1, Ni)            bias row (broadcasts over batch)
    out   : (tm, N_last)
    Intermediates live entirely in vregs/VMEM — no HBM round trips.
    """
    x_ref = refs[0]
    out_ref = refs[-1]

    h = x_ref[...].astype(jnp.float32)
    for i in range(n_layers):
        w = refs[1 + 2 * i][...]
        b = refs[2 + 2 * i][...]
        h = jnp.dot(h, w, preferred_element_type=jnp.float32) + b
        if i < n_layers - 1:          # ReLU between all but the last layer
            h = jnp.maximum(h, 0.0)
    out_ref[...] = h.astype(out_ref.dtype)


def _pick_batch_tile(m: int) -> int:
    """Largest batch tile that satisfies the (8,128) block rule.

    Either tm == M (full batch, always legal) or tm divides M and is a
    multiple of 8 (sublane-dense).  Big tiles amortize per-step overhead.
    """
    if m <= 1024 or m % 8 != 0:
        return m
    for t in (1024, 512, 256, 128, 64, 32, 16, 8):
        if m % t == 0:
            return t
    return m


def mlp_fused_pallas(x: jax.Array,
                     params: Sequence[Tuple[jax.Array, jax.Array]]) -> jax.Array:
    """y = relu(...relu(x @ W0 + b0)...) @ W_last + b_last  in one kernel."""
    M, K0 = x.shape
    n_layers = len(params)
    assert params[0][0].shape[0] == K0

    tm = _pick_batch_tile(M)
    grid = (M // tm,)

    in_specs = [pl.BlockSpec((tm, K0), lambda i: (i, 0))]
    flat_inputs = [x]
    for (w, b) in params:
        K, N = w.shape
        # Weights/biases: full-array blocks, resident in VMEM across the grid.
        in_specs.append(pl.BlockSpec((K, N), lambda i: (0, 0)))
        in_specs.append(pl.BlockSpec((1, N), lambda i: (0, 0)))
        flat_inputs.append(w)
        flat_inputs.append(b)

    n_out = params[-1][0].shape[1]
    kernel = functools.partial(_mlp_fused_kernel, n_layers=n_layers)

    return pl.pallas_call(
        kernel,
        out_shape=jax.ShapeDtypeStruct((M, n_out), x.dtype),
        grid_spec=pl.GridSpec(
            grid=grid,
            in_specs=in_specs,
            out_specs=pl.BlockSpec((tm, n_out), lambda i: (i, 0)),
        ),
        compiler_params=pltpu.CompilerParams(
            # Batch axis is independent -> megacore sharding on v7x.
            dimension_semantics=("parallel",)),
    )(*flat_inputs)


# ---------------------------------------------------------------------------
# Jitted forward (reshape + fused kernel, no eager per-layer dispatch)
# ---------------------------------------------------------------------------
@functools.partial(jax.jit, static_argnames=("flatten_start_dim",))
def mlp_apply(params, x: jax.Array,
              flatten_start_dim: Optional[int] = None) -> jax.Array:
    if flatten_start_dim is not None:
        # torch.flatten(x, start_dim=d): keep leading dims, merge the rest.
        x = x.reshape(x.shape[:flatten_start_dim] + (-1,))
    return mlp_fused_pallas(x, params)


# ---------------------------------------------------------------------------
# Module
# ---------------------------------------------------------------------------
class MLP:
    """JAX/Pallas port of dissect.models.mlp.MLP (Linear + ReLU stack)."""

    def __init__(self, sizes: List[int], key: jax.Array) -> None:
        self.sizes = sizes
        self.params: List[Tuple[jax.Array, jax.Array]] = []
        for i in range(len(sizes) - 1):
            fan_in, fan_out = sizes[i], sizes[i + 1]
            key, wk, bk = jax.random.split(key, 3)
            bound = 1.0 / jnp.sqrt(fan_in)  # PyTorch Linear default init range
            # PyTorch stores W as (out, in); we store it pre-transposed as
            # (in, out) ONCE here so the forward pass has no runtime transpose.
            w_t = jax.random.uniform(wk, (fan_out, fan_in), jnp.float32,
                                     -bound, bound).T
            b = jax.random.uniform(bk, (fan_out,), jnp.float32,
                                   -bound, bound).reshape(1, fan_out)
            self.params.append((w_t, b))

    def __call__(self, x: jax.Array,
                 flatten_start_dim: Optional[int] = None) -> jax.Array:
        return mlp_apply(tuple(self.params), x,
                         flatten_start_dim=flatten_start_dim)


# ---------------------------------------------------------------------------
# Pure-JAX reference (PyTorch semantics) for correctness checking
# ---------------------------------------------------------------------------
def _reference_forward(mlp: MLP, x: jax.Array,
                       flatten_start_dim: Optional[int]) -> jax.Array:
    if flatten_start_dim is not None:
        x = x.reshape(x.shape[:flatten_start_dim] + (-1,))
    n = len(mlp.params)
    for i, (w_t, b) in enumerate(mlp.params):
        x = x @ w_t + b          # w_t is (in, out): same as PyTorch x @ W.T
        if i < n - 1:
            x = jnp.maximum(x, 0.0)
    return x


if __name__ == "__main__":
    key = jax.random.PRNGKey(0)
    key, xk, pk = jax.random.split(key, 3)

    # sizes -> Linear(32,64) + ReLU + Linear(64,48) + ReLU + Linear(48,16)
    sizes = [32, 64, 48, 16]
    mlp = MLP(sizes, pk)

    # Input (2, 4, 4, 2); flatten_start_dim=1 -> (2, 32) feeding the first Linear.
    x = jax.random.normal(xk, (2, 4, 4, 2), dtype=jnp.float32)

    out = mlp(x, flatten_start_dim=1)
    out = jax.block_until_ready(out)

    ref = _reference_forward(mlp, x, flatten_start_dim=1)
    assert out.shape == (2, sizes[-1]), out.shape
    assert jnp.allclose(out, ref, atol=1e-5, rtol=1e-5), "mismatch vs reference"

    print("KERNEL_OK")
</pallas_src>

<mosaic_0001>
module attributes {stable_mosaic.version = 11 : i64} {
  func.func @_mlp_fused_kernel(%arg0: i32, %arg1: memref<2x32xf32, #tpu.memory_space<vmem>>, %arg2: memref<32x64xf32, #tpu.memory_space<vmem>>, %arg3: memref<1x64xf32, #tpu.memory_space<vmem>>, %arg4: memref<64x48xf32, #tpu.memory_space<vmem>>, %arg5: memref<1x48xf32, #tpu.memory_space<vmem>>, %arg6: memref<48x16xf32, #tpu.memory_space<vmem>>, %arg7: memref<1x16xf32, #tpu.memory_space<vmem>>, %arg8: memref<2x16xf32, #tpu.memory_space<vmem>>) attributes {dimension_semantics = [#tpu.dimension_semantics<parallel>], iteration_bounds = array<i64: 1>, scalar_prefetch = 0 : i64, scratch_operands = 0 : i64, tpu.core_type = #tpu.core_type<tc>, window_params = [{transform_indices = @transform_0, window_bounds = array<i64: 2, 32>}, {pipeline_mode = #tpu.pipeline_mode<synchronous>, transform_indices = @transform_1, window_bounds = array<i64: 32, 64>}, {pipeline_mode = #tpu.pipeline_mode<synchronous>, transform_indices = @transform_2, window_bounds = array<i64: 1, 64>}, {pipeline_mode = #tpu.pipeline_mode<synchronous>, transform_indices = @transform_3, window_bounds = array<i64: 64, 48>}, {pipeline_mode = #tpu.pipeline_mode<synchronous>, transform_indices = @transform_4, window_bounds = array<i64: 1, 48>}, {pipeline_mode = #tpu.pipeline_mode<synchronous>, transform_indices = @transform_5, window_bounds = array<i64: 48, 16>}, {pipeline_mode = #tpu.pipeline_mode<synchronous>, transform_indices = @transform_6, window_bounds = array<i64: 1, 16>}, {transform_indices = @transform_7, window_bounds = array<i64: 2, 16>}]} {
    %c0 = arith.constant 0 : index
    %c0_0 = arith.constant 0 : index
    %0 = vector.load %arg1[%c0, %c0_0] : memref<2x32xf32, #tpu.memory_space<vmem>>, vector<2x32xf32>
    %c0_1 = arith.constant 0 : index
    %c0_2 = arith.constant 0 : index
    %1 = vector.load %arg2[%c0_1, %c0_2] : memref<32x64xf32, #tpu.memory_space<vmem>>, vector<32x64xf32>
    %c0_3 = arith.constant 0 : index
    %c0_4 = arith.constant 0 : index
    %2 = vector.load %arg3[%c0_3, %c0_4] : memref<1x64xf32, #tpu.memory_space<vmem>>, vector<1x64xf32>
    %cst = arith.constant dense<0.000000e+00> : vector<2x64xf32>
    %3 = tpu.matmul %0, %1, %cst {dimension_numbers = #tpu.dot_dimension_numbers<[1], [0], [0], [1], [0, 0, 1, 1], [], []>} : vector<2x32xf32>, vector<32x64xf32>, vector<2x64xf32> -> vector<2x64xf32>
    %4 = vector.broadcast %2 : vector<1x64xf32> to vector<2x64xf32>
    %5 = arith.addf %3, %4 : vector<2x64xf32>
    %cst_5 = arith.constant 0.000000e+00 : f32
    %6 = vector.broadcast %cst_5 : f32 to vector<2x64xf32>
    %7 = arith.maximumf %5, %6 : vector<2x64xf32>
    %c0_6 = arith.constant 0 : index
    %c0_7 = arith.constant 0 : index
    %8 = vector.load %arg4[%c0_6, %c0_7] : memref<64x48xf32, #tpu.memory_space<vmem>>, vector<64x48xf32>
    %c0_8 = arith.constant 0 : index
    %c0_9 = arith.constant 0 : index
    %9 = vector.load %arg5[%c0_8, %c0_9] : memref<1x48xf32, #tpu.memory_space<vmem>>, vector<1x48xf32>
    %cst_10 = arith.constant dense<0.000000e+00> : vector<2x48xf32>
    %10 = tpu.matmul %7, %8, %cst_10 {dimension_numbers = #tpu.dot_dimension_numbers<[1], [0], [0], [1], [0, 0, 1, 1], [], []>} : vector<2x64xf32>, vector<64x48xf32>, vector<2x48xf32> -> vector<2x48xf32>
    %11 = vector.broadcast %9 : vector<1x48xf32> to vector<2x48xf32>
    %12 = arith.addf %10, %11 : vector<2x48xf32>
    %cst_11 = arith.constant 0.000000e+00 : f32
    %13 = vector.broadcast %cst_11 : f32 to vector<2x48xf32>
    %14 = arith.maximumf %12, %13 : vector<2x48xf32>
    %c0_12 = arith.constant 0 : index
    %c0_13 = arith.constant 0 : index
    %15 = vector.load %arg6[%c0_12, %c0_13] : memref<48x16xf32, #tpu.memory_space<vmem>>, vector<48x16xf32>
    %c0_14 = arith.constant 0 : index
    %c0_15 = arith.constant 0 : index
    %16 = vector.load %arg7[%c0_14, %c0_15] : memref<1x16xf32, #tpu.memory_space<vmem>>, vector<1x16xf32>
    %cst_16 = arith.constant dense<0.000000e+00> : vector<2x16xf32>
    %17 = tpu.matmul %14, %15, %cst_16 {dimension_numbers = #tpu.dot_dimension_numbers<[1], [0], [0], [1], [0, 0, 1, 1], [], []>} : vector<2x48xf32>, vector<48x16xf32>, vector<2x16xf32> -> vector<2x16xf32>
    %18 = vector.broadcast %16 : vector<1x16xf32> to vector<2x16xf32>
    %19 = arith.addf %17, %18 : vector<2x16xf32>
    %c0_17 = arith.constant 0 : index
    %c0_18 = arith.constant 0 : index
    %20 = vector.load %arg8[%c0_17, %c0_18] : memref<2x16xf32, #tpu.memory_space<vmem>>, vector<2x16xf32>
    tpu.vector_store %arg8[%c0_17, %c0_18], %19 {strides = array<i32>} : memref<2x16xf32, #tpu.memory_space<vmem>>, vector<2x16xf32>,
    return
  }
  func.func @transform_0(%arg0: i32) -> (i32, i32) {
    %c0_i32 = arith.constant 0 : i32
    %c0_i32_0 = arith.constant 0 : i32
    return %arg0, %c0_i32 : i32, i32
  }
  func.func @transform_1(%arg0: i32) -> (i32, i32) {
    %c0_i32 = arith.constant 0 : i32
    %c0_i32_0 = arith.constant 0 : i32
    %c0_i32_1 = arith.constant 0 : i32
    return %c0_i32, %c0_i32_0 : i32, i32
  }
  func.func @transform_2(%arg0: i32) -> (i32, i32) {
    %c0_i32 = arith.constant 0 : i32
    %c0_i32_0 = arith.constant 0 : i32
    %c0_i32_1 = arith.constant 0 : i32
    return %c0_i32, %c0_i32_0 : i32, i32
  }
  func.func @transform_3(%arg0: i32) -> (i32, i32) {
    %c0_i32 = arith.constant 0 : i32
    %c0_i32_0 = arith.constant 0 : i32
    %c0_i32_1 = arith.constant 0 : i32
    return %c0_i32, %c0_i32_0 : i32, i32
  }
  func.func @transform_4(%arg0: i32) -> (i32, i32) {
    %c0_i32 = arith.constant 0 : i32
    %c0_i32_0 = arith.constant 0 : i32
    %c0_i32_1 = arith.constant 0 : i32
    return %c0_i32, %c0_i32_0 : i32, i32
  }
  func.func @transform_5(%arg0: i32) -> (i32, i32) {
    %c0_i32 = arith.constant 0 : i32
    %c0_i32_0 = arith.constant 0 : i32
    %c0_i32_1 = arith.constant 0 : i32
    return %c0_i32, %c0_i32_0 : i32, i32
  }
  func.func @transform_6(%arg0: i32) -> (i32, i32) {
    %c0_i32 = arith.constant 0 : i32
    %c0_i32_0 = arith.constant 0 : i32
    %c0_i32_1 = arith.constant 0 : i32
    return %c0_i32, %c0_i32_0 : i32, i32
  }
  func.func @transform_7(%arg0: i32) -> (i32, i32) {
    %c0_i32 = arith.constant 0 : i32
    %c0_i32_0 = arith.constant 0 : i32
    return %arg0, %c0_i32 : i32, i32
  }
}

</mosaic_0001>

<bundles_post_ra>
// kernel: mlp_apply.1
= control target key start
LH: loop header
LB: loop body
LE: loop exit
PB: predicated region body
PF: predicated region fallthrough
CT: control target
= control target key end

     0   :  { %v434_v3 = vmov 0.0|0.0   ;;  %vm435_vm0 = vmmov 0   ;;  %v436_v6 = vmov 0.0   ;;  %s559_s0 = inlined_call_operand.vmem [shape: f32[2,32], index: 0, kind: input, shape index: {}]   ;;  %s560_s1 = inlined_call_operand.vmem [shape: f32[32,64], index: 1, kind: input, shape index: {}]   ;;  %s561_s2 = inlined_call_operand.vmem [shape: f32[1,64], index: 2, kind: input, shape index: {}]   ;;  %s562_s3 = inlined_call_operand.vmem [shape: f32[64,48], index: 3, kind: input, shape index: {}]   ;;  %s563_s4 = inlined_call_operand.vmem [shape: f32[1,48], index: 4, kind: input, shape index: {}]   ;;  %s564_s5 = inlined_call_operand.vmem [shape: f32[48,16], index: 5, kind: input, shape index: {}]   ;;  %s565_s6 = inlined_call_operand.vmem [shape: f32[1,16], index: 6, kind: input, shape index: {}]   ;;  %s566_s7 = inlined_call_operand.hbm [shape: f32[2,16], index: 7, kind: output, shape index: {}]  }
   0x1   :  { %v28_v0 = vld [vmem:[%s560_s1] sm:$0xff]  ;;  %v29_v1 = vld [vmem:[%s560_s1 + $0x8] sm:$0xff]  ;;  %v30_v2 = vld [vmem:[%s560_s1 + $0x10] sm:$0xff]  ;;  %379 = vmatprep.subr.bf16.mxu0 %v434_v3  ;;  %342 = vmatprep.mubr.msk.f32.mxu0 %vm435_vm0, %v436_v6 }
   0x2   :  { %v380_v4 = vpack.c.bf16 %v29_v1, %v28_v0  ;;  %v31_v5 = vld [vmem:[%s560_s1 + $0x18] sm:$0xff]  ;;  %v114_v7 = vld [vmem:[%s562_s3] sm:$0xff]  ;;  %385 = vmatprep.subr.bf16.mxu1 %v434_v3  ;;  %v115_v8 = vld [vmem:[%s562_s3 + $0x8] sm:$0xff]  ;;  %361 = vmatprep.mubr.msk.f32.mxu1 %vm435_vm0, %v436_v6 }
   0x3   :  { %v116_v9 = vld [vmem:[%s562_s3 + $0x10] sm:$0xff]  ;;  %v117_v10 = vld [vmem:[%s562_s3 + $0x18] sm:$0xff]  ;;  %v383_v11 = vpack.c.bf16 %v31_v5, %v30_v2  ;;  %v386_v12 = vpack.c.bf16 %v115_v8, %v114_v7 }
   0x4   :  { %381 = vmatpush3.bf16.msra.mxu0 %v380_v4 }
   0x5   :  { %382 = vmatprep.subr.bf16.mxu0 %v434_v3 }
   0x6   :  { %12 = vsyncpa [#allocation3], 0  ;;  %387 = vmatpush3.bf16.msra.mxu1 %v386_v12  ;;  %v389_v13 = vpack.c.bf16 %v117_v10, %v116_v9  ;;  %v118_v14 = vld [vmem:[%s562_s3 + $0x20] sm:$0xff]  ;;  %v119_v15 = vld [vmem:[%s562_s3 + $0x28] sm:$0xff]  ;;  %vm39_vm1 = vcmask 261120   ;;  %vm129_vm2 = vcmask 523264  }
   0x7   :  { %388 = vmatprep.subr.bf16.mxu1 %v434_v3  ;;  %v27_v16 = vld [vmem:[%s559_s0] sm:$0x3]  ;;  %v392_v17 = vpack.c.bf16 %v119_v15, %v118_v14  ;;  %v120_v18 = vld [vmem:[%s562_s3 + $0x30] sm:$0xff]  ;;  %v121_v19 = vld [vmem:[%s562_s3 + $0x38] sm:$0xff]  ;;  %vm217_vm3 = vcmask 392192   ;;  %s437_s17 = smov [#allocation2]  }
   0x8   :  { %384 = vmatpush3.bf16.msra.mxu0 %v383_v11  ;;  %v395_v20 = vpack.c.bf16 %v121_v19, %v120_v18  ;;  %v204_v21 = vld [vmem:[%s564_s5] sm:$0xff]  ;;  %v205_v22 = vld [vmem:[%s564_s5 + $0x8] sm:$0xff]  ;;  %v206_v23 = vld [vmem:[%s564_s5 + $0x10] sm:$0xff]  ;;  %s299_s18 = sshll.u32 %s437_s17, 4  ;;  %vm291_vm4 = vcmask 123904   ;;  %s300_s18 = int_to_ptr.vmem [resolvable:$true] %s299_s18 }
   0x9   :  { %397 = vmatprep.subr.bf16.mxu0 %v434_v3  ;;  %v398_v24 = vpack.c.bf16 %v205_v22, %v204_v21  ;;  %v207_v25 = vld [vmem:[%s564_s5 + $0x18] sm:$0xff]  ;;  %v307_v27 = vld [vmem:[%s561_s2] ss:$0 sm:$0xff]  ;;  %v209_v33 = vld [vmem:[%s564_s5 + $0x28] sm:$0xff]  ;;  %p415_p1 = scmp.lt.s32.totalorder %s300_s18, %s300_s18 }
   0xa   :  { %390 = vmatpush3.bf16.msra.mxu1 %v389_v13  ;;  %v401_v26 = vpack.c.bf16 %v207_v25, %v206_v23  ;;  %v208_v32 = vld [vmem:[%s564_s5 + $0x20] sm:$0xff]  ;;  %s410_s5 = scalar_lea.vmem %s300_s18, 32 }
   0xb   :  { %343 = vmatmul.mubr.msk.f32.vlgmr.msra.gmra.mrb[0].mxu0 %vm39_vm1, %v27_v16  ;;  %391 = vmatprep.subr.bf16.mxu1 %v434_v3  ;;  %v404_v34 = vpack.c.bf16 %v209_v33, %v208_v32  ;;  %v309_v35 = vld [vmem:[%s563_s4] ss:$0 sm:$0xff]  ;;  %p411_p0 = scmp.ne.s32.totalorder %s300_s18, %s410_s5  ;;  %p416_p2 = scmp.lt.s32.totalorder %s410_s5, %s410_s5 }
   0xc   :  { %376 = vmatprep.mubr.msk.f32.mxu0 %vm435_vm0, %v436_v6  ;;  %399 = vmatpush3.bf16.msra.mxu0 %v398_v24  ;;  %v311_v40 = vld [vmem:[%s565_s6] ss:$0 sm:$0xff] }
   0xd   :  { %400 = vmatprep.subr.bf16.mxu0 %v434_v3  ;;  %p417_p3 = por %p416_p2, %p415_p1 }
   0xe   :  { %393 = vmatpush3.bf16.msra.mxu1 %v392_v17 }
   0xf   :  { %394 = vmatprep.subr.bf16.mxu1 %v434_v3  ;;  %p418_p4 = pnand %p417_p3, %p411_p0 }
  0x10   :  { %402 = vmatpush3.bf16.msra.mxu0 %v401_v26 }
  0x11   :  { %403 = vmatprep.subr.bf16.mxu0 %v434_v3 }
  0x12   :  { %396 = vmatpush3.bf16.msra.mxu1 %v395_v20 }
  0x14   :  { %405 = vmatpush3.bf16.msra.mxu0 %v404_v34 }
  0xde   :  { %v109_v28 = vpop.f32.mrb[0].mxu0 }
  0xdf   :  { %v110_v29 = vadd.f32 %v307_v27, %v109_v28  ;;  %v344_v30 = vpop.f32.mrb[1].mxu0 }
  0xe1   :  { %v113_v31 = vmax.f32 %v110_v29, 0.0 }
  0xe3   :  { %362 = vmatmul.mubr.msk.f32.vlgmr.msra.gmra.mrb[0].mxu1 %vm129_vm2, %v113_v31 }
 0x1b6   :  { %v199_v36 = vpop.f32.mrb[0].mxu1 }
 0x1b7   :  { %v200_v37 = vadd.f32 %v309_v35, %v199_v36  ;;  %v363_v38 = vpop.f32.mrb[1].mxu1 }
 0x1b9   :  { %v203_v39 = vmax.f32 %v200_v37, 0.0 }
 0x1bb   :  { %377 = vmatmul.mubr.msk.f32.vlgmr.msra.gmra.mrb[2].mxu0 %vm217_vm3, %v203_v39 }
 0x28e   :  { %v287_v41 = vpop.f32.mrb[2].mxu0 }
 0x28f   :  { %v288_v42 = vadd.f32 %v311_v40, %v287_v41  ;;  %v378_v43 = vpop.f32.mrb[3].mxu0 }
 0x291   :  { %292 = vst.msk [vmem:[#allocation2] sm:$0x3] %vm291_vm4, %v288_v42 }
 0x292   :  { %421 = shalt.err (!%p418_p4)
}
 0x293   :  { %s422_s20 = scalar_lea.hbm %s566_s7, 32 }
 0x294   :  { %p423_p5 = scmp.ne.s32.totalorder %s566_s7, %s422_s20  ;;  %p426_p6 = scmp.lt.u32.totalorder %s422_s20, %s566_s7 }
 0x296   :  { %p428_p7 = pnand %p426_p6, %p423_p5 }
 0x298   :  { %431 = shalt.err (!%p428_p7)
}
 0x299   :  { %302 = dma.vmem_to_hbm [thread:$0]  %s300_s18, 32, %s566_s7, [#allocation3]  }
 0x29a   :  { %432 = dma.done.wait [#allocation3], 32  }
 0x29b   :  { %433 = vsyncadd [#allocation3], 4294967264 }
 0x29c   :  { %306 = vsyncpa [#allocation3], 1 }

</bundles_post_ra>
